<compile_context>
chip_gen: v5e
topology: v5e:2x2
jax: 0.10.0
libtpu: 0.0.40
codegen_flags: <defaults>
</compile_context>

<pallas_src>
import jax
import jax.numpy as jnp
from jax.experimental import pallas as pl
from jax.experimental.pallas import tpu as pltpu


def _pixel_attention_kernel(x_ref, w1t_ref, b1_ref, w2t_ref, b2_ref, o_ref):
    # x_ref: (C, TS) slab (channels on sublanes, pixels on lanes).
    # w1t: (Ch, C), b1: (Ch, 1), w2t: (C, Ch), b2: (C, 1)  -- tiny, resident.
    x = x_ref[...]  # native dtype; no full-tile f32 copy

    # conv1 (1x1) == channel matmul, + bias, relu  (f32 accumulation on MXU)
    h = jnp.dot(w1t_ref[...], x, preferred_element_type=jnp.float32) + b1_ref[...]
    h = jnp.maximum(h, 0.0)

    # conv2 (1x1) == channel matmul back to C, + bias, sigmoid
    a = jnp.dot(w2t_ref[...], h.astype(w2t_ref.dtype),
                preferred_element_type=jnp.float32) + b2_ref[...]
    a = jax.nn.sigmoid(a)  # exp lowers to the EUP slot; kernel is HBM-bound

    # elementwise gate of the original input (lane-dense store)
    o_ref[...] = (x * a.astype(x.dtype)).astype(o_ref.dtype)


def pixel_attention(x_nchw, w1, b1, w2, b2):
    """PixelAttention forward.

    x_nchw: (N, C, H, W)
    w1:     (C, C//8)   (conv1 weight stored as (C_in, C_out))
    b1:     (C//8,)
    w2:     (C//8, C)
    b2:     (C,)
    """
    N, C, H, W = x_nchw.shape
    Ch = w1.shape[1]
    assert w1.shape == (C, Ch) and w2.shape == (Ch, C)
    assert b1.shape == (Ch,) and b2.shape == (C,)

    HW = H * W
    itemsize = jnp.dtype(x_nchw.dtype).itemsize

    # --- per-generation VMEM budget -----------------------------------------
    try:
        vmem_phys = int(pltpu.get_tpu_info().vmem_capacity_bytes)
    except Exception:  # fall back to the smallest generation (v7x per-TC)
        vmem_phys = 64 * 1024 * 1024
    # 96 MiB on 128-MiB parts (v5e/v6e), 48 MiB on the 64-MiB part (v7x).
    vmem_limit = min(int(vmem_phys * 0.75), 112 * 1024 * 1024)

    # Per-pixel VMEM footprint of one grid step:
    #   double-buffered in + out tiles:                4 * C * itemsize
    #   in-kernel f32 temporaries (h, a, x*a product): (3*C + Ch) * 4
    bytes_per_pixel = 4 * C * itemsize + (3 * C + Ch) * 4
    ts_cap = max(128, int(vmem_limit * 0.85) // bytes_per_pixel)

    # --- spatial tile size ----------------------------------------------------
    ts = min(ts_cap, HW)
    if HW > 128:
        ts = max(128, (ts // 128) * 128)  # lane-dense: multiple of 128
        if HW % ts != 0:
            # Prefer an exact 128-multiple divisor close to the cap (no partial
            # tail block at all); otherwise keep ts and let Pallas mask the tail
            # store (no host-side pad/slice copies).
            ts0 = ts
            cand = ts0
            while cand >= 128 and 2 * cand > ts0:
                if HW % cand == 0:
                    ts = cand
                    break
                cand -= 128
    # else: ts == HW <= 128 -> block spans the full (exempt) last dim.
    n_s = pl.cdiv(HW, ts)

    # v7x has 2 TensorCores: make sure the parallel grid has >= 2 steps.
    if N * n_s < 2 and HW >= 256:
        ts = max(128, ((pl.cdiv(HW, 2) + 127) // 128) * 128)
        n_s = pl.cdiv(HW, ts)

    # NCHW -> (N, C, H*W): free reshape of contiguous memory (no transpose,
    # no pad — the ragged tail tile is handled by partial-block masking).
    x3d = x_nchw.reshape(N, C, HW)

    # Weight orientation for channels-on-sublanes layout (tiny transposes).
    # Weights in the input dtype so the MXU runs at its native rate; biases f32.
    w1t = jnp.transpose(w1).astype(x_nchw.dtype)   # (Ch, C)
    w2t = jnp.transpose(w2).astype(x_nchw.dtype)   # (C, Ch)
    b1_2d = b1.reshape(Ch, 1).astype(jnp.float32)
    b2_2d = b2.reshape(C, 1).astype(jnp.float32)

    cost = pl.CostEstimate(
        flops=4 * N * HW * C * Ch + 3 * N * C * HW,
        transcendentals=N * C * HW,
        bytes_accessed=2 * N * C * HW * itemsize
        + (w1t.size + w2t.size + b1_2d.size + b2_2d.size) * 4,
    )

    out3d = pl.pallas_call(
        _pixel_attention_kernel,
        out_shape=jax.ShapeDtypeStruct((N, C, HW), x3d.dtype),
        grid_spec=pltpu.PrefetchScalarGridSpec(
            num_scalar_prefetch=0,
            grid=(N, n_s),
            in_specs=[
                # input pixels: one (C, TS) slab per grid point
                pl.BlockSpec((None, C, ts), lambda n, s: (n, 0, s)),
                # weights / biases: whole arrays, constant index -> resident
                pl.BlockSpec((Ch, C), lambda n, s: (0, 0)),
                pl.BlockSpec((Ch, 1), lambda n, s: (0, 0)),
                pl.BlockSpec((C, Ch), lambda n, s: (0, 0)),
                pl.BlockSpec((C, 1), lambda n, s: (0, 0)),
            ],
            out_specs=pl.BlockSpec((None, C, ts), lambda n, s: (n, 0, s)),
        ),
        compiler_params=pltpu.CompilerParams(
            dimension_semantics=("parallel", "parallel"),
            vmem_limit_bytes=vmem_limit,
        ),
        cost_estimate=cost,
    )(x3d, w1t, b1_2d, w2t, b2_2d)

    return out3d.reshape(N, C, H, W)


def _reference(x_nchw, w1, b1, w2, b2):
    # Pure-JAX reference of the PyTorch forward (1x1 convs as channel matmuls).
    xf = x_nchw.astype(jnp.float32)
    h = jnp.einsum("nchw,cd->ndhw", xf, w1) + b1[None, :, None, None]
    h = jnp.maximum(h, 0.0)
    a = jnp.einsum("ndhw,dc->nchw", h, w2) + b2[None, :, None, None]
    a = jax.nn.sigmoid(a)
    return (xf * a).astype(x_nchw.dtype)


if __name__ == "__main__":
    # Small shapes consistent with the module (channel must be divisible by 8).
    N, C, H, W = 2, 32, 16, 16
    Ch = C // 8

    key = jax.random.PRNGKey(0)
    kx, k1, k2, k3, k4 = jax.random.split(key, 5)

    x = jax.random.normal(kx, (N, C, H, W), dtype=jnp.float32)

    # Deterministic synthetic parameters (conv weights stored as (C_in, C_out)).
    w1 = jax.random.normal(k1, (C, Ch), dtype=jnp.float32) * 0.1
    b1 = jax.random.normal(k2, (Ch,), dtype=jnp.float32) * 0.1
    w2 = jax.random.normal(k3, (Ch, C), dtype=jnp.float32) * 0.1
    b2 = jax.random.normal(k4, (C,), dtype=jnp.float32) * 0.1

    out = pixel_attention(x, w1, b1, w2, b2)
    out = jax.block_until_ready(out)

    ref = _reference(x, w1, b1, w2, b2)
    assert out.shape == (N, C, H, W)
    assert jnp.allclose(out, ref, atol=1e-5, rtol=1e-5)

    print("KERNEL_OK")
</pallas_src>

<mosaic_0001>
module attributes {stable_mosaic.version = 11 : i64} {
  func.func @_pixel_attention_kernel(%arg0: i32, %arg1: i32, %arg2: memref<1x32x256xf32, #tpu.memory_space<vmem>>, %arg3: memref<4x32xf32, #tpu.memory_space<vmem>>, %arg4: memref<4x1xf32, #tpu.memory_space<vmem>>, %arg5: memref<32x4xf32, #tpu.memory_space<vmem>>, %arg6: memref<32x1xf32, #tpu.memory_space<vmem>>, %arg7: memref<1x32x256xf32, #tpu.memory_space<vmem>>) attributes {dimension_semantics = [#tpu.dimension_semantics<parallel>, #tpu.dimension_semantics<parallel>], iteration_bounds = array<i64: 2, 1>, scalar_prefetch = 0 : i64, scratch_operands = 0 : i64, tpu.core_type = #tpu.core_type<tc>, window_params = [{transform_indices = @transform_0, window_bounds = array<i64: 1, 32, 256>}, {pipeline_mode = #tpu.pipeline_mode<synchronous>, transform_indices = @transform_1, window_bounds = array<i64: 4, 32>}, {pipeline_mode = #tpu.pipeline_mode<synchronous>, transform_indices = @transform_2, window_bounds = array<i64: 4, 1>}, {pipeline_mode = #tpu.pipeline_mode<synchronous>, transform_indices = @transform_3, window_bounds = array<i64: 32, 4>}, {pipeline_mode = #tpu.pipeline_mode<synchronous>, transform_indices = @transform_4, window_bounds = array<i64: 32, 1>}, {transform_indices = @transform_5, window_bounds = array<i64: 1, 32, 256>}]} {
    %c0 = arith.constant 0 : index
    %c0_0 = arith.constant 0 : index
    %c0_1 = arith.constant 0 : index
    %0 = vector.load %arg2[%c0, %c0_0, %c0_1] : memref<1x32x256xf32, #tpu.memory_space<vmem>>, vector<1x32x256xf32>
    %1 = vector.shape_cast %0 : vector<1x32x256xf32> to vector<32x256xf32>
    %c0_2 = arith.constant 0 : index
    %c0_3 = arith.constant 0 : index
    %2 = vector.load %arg3[%c0_2, %c0_3] : memref<4x32xf32, #tpu.memory_space<vmem>>, vector<4x32xf32>
    %cst = arith.constant dense<0.000000e+00> : vector<4x256xf32>
    %3 = tpu.matmul %2, %1, %cst {dimension_numbers = #tpu.dot_dimension_numbers<[1], [0], [0], [1], [0, 0, 1, 1], [], []>} : vector<4x32xf32>, vector<32x256xf32>, vector<4x256xf32> -> vector<4x256xf32>
    %c0_4 = arith.constant 0 : index
    %c0_5 = arith.constant 0 : index
    %4 = vector.load %arg4[%c0_4, %c0_5] : memref<4x1xf32, #tpu.memory_space<vmem>>, vector<4x1xf32>
    %5 = vector.broadcast %4 : vector<4x1xf32> to vector<4x256xf32>
    %6 = arith.addf %3, %5 : vector<4x256xf32>
    %cst_6 = arith.constant 0.000000e+00 : f32
    %7 = vector.broadcast %cst_6 : f32 to vector<4x256xf32>
    %8 = arith.maximumf %6, %7 : vector<4x256xf32>
    %c0_7 = arith.constant 0 : index
    %c0_8 = arith.constant 0 : index
    %9 = vector.load %arg5[%c0_7, %c0_8] : memref<32x4xf32, #tpu.memory_space<vmem>>, vector<32x4xf32>
    %cst_9 = arith.constant dense<0.000000e+00> : vector<32x256xf32>
    %10 = tpu.matmul %9, %8, %cst_9 {dimension_numbers = #tpu.dot_dimension_numbers<[1], [0], [0], [1], [0, 0, 1, 1], [], []>} : vector<32x4xf32>, vector<4x256xf32>, vector<32x256xf32> -> vector<32x256xf32>
    %c0_10 = arith.constant 0 : index
    %c0_11 = arith.constant 0 : index
    %11 = vector.load %arg6[%c0_10, %c0_11] : memref<32x1xf32, #tpu.memory_space<vmem>>, vector<32x1xf32>
    %12 = vector.broadcast %11 : vector<32x1xf32> to vector<32x256xf32>
    %13 = arith.addf %10, %12 : vector<32x256xf32>
    %14 = arith.negf %13 : vector<32x256xf32>
    %15 = math.exp %14 : vector<32x256xf32>
    %cst_12 = arith.constant 1.000000e+00 : f32
    %16 = vector.broadcast %cst_12 : f32 to vector<32x256xf32>
    %17 = arith.addf %16, %15 : vector<32x256xf32>
    %18 = arith.divf %16, %17 : vector<32x256xf32>
    %19 = arith.mulf %1, %18 : vector<32x256xf32>
    %c0_13 = arith.constant 0 : index
    %c0_14 = arith.constant 0 : index
    %c0_15 = arith.constant 0 : index
    %20 = vector.load %arg7[%c0_13, %c0_14, %c0_15] : memref<1x32x256xf32, #tpu.memory_space<vmem>>, vector<1x32x256xf32>
    %21 = vector.shape_cast %20 : vector<1x32x256xf32> to vector<32x256xf32>
    %22 = vector.shape_cast %19 : vector<32x256xf32> to vector<1x32x256xf32>
    tpu.vector_store %arg7[%c0_13, %c0_14, %c0_15], %22 {strides = array<i32>} : memref<1x32x256xf32, #tpu.memory_space<vmem>>, vector<1x32x256xf32>,
    return
  }
  func.func @transform_0(%arg0: i32, %arg1: i32) -> (i32, i32, i32) {
    %c0_i32 = arith.constant 0 : i32
    %c0_i32_0 = arith.constant 0 : i32
    return %arg0, %c0_i32, %arg1 : i32, i32, i32
  }
  func.func @transform_1(%arg0: i32, %arg1: i32) -> (i32, i32) {
    %c0_i32 = arith.constant 0 : i32
    %c0_i32_0 = arith.constant 0 : i32
    %c0_i32_1 = arith.constant 0 : i32
    return %c0_i32, %c0_i32_0 : i32, i32
  }
  func.func @transform_2(%arg0: i32, %arg1: i32) -> (i32, i32) {
    %c0_i32 = arith.constant 0 : i32
    %c0_i32_0 = arith.constant 0 : i32
    %c0_i32_1 = arith.constant 0 : i32
    return %c0_i32, %c0_i32_0 : i32, i32
  }
  func.func @transform_3(%arg0: i32, %arg1: i32) -> (i32, i32) {
    %c0_i32 = arith.constant 0 : i32
    %c0_i32_0 = arith.constant 0 : i32
    %c0_i32_1 = arith.constant 0 : i32
    return %c0_i32, %c0_i32_0 : i32, i32
  }
  func.func @transform_4(%arg0: i32, %arg1: i32) -> (i32, i32) {
    %c0_i32 = arith.constant 0 : i32
    %c0_i32_0 = arith.constant 0 : i32
    %c0_i32_1 = arith.constant 0 : i32
    return %c0_i32, %c0_i32_0 : i32, i32
  }
  func.func @transform_5(%arg0: i32, %arg1: i32) -> (i32, i32, i32) {
    %c0_i32 = arith.constant 0 : i32
    %c0_i32_0 = arith.constant 0 : i32
    return %arg0, %c0_i32, %arg1 : i32, i32, i32
  }
}

</mosaic_0001>

<bundles_post_ra>
// kernel: tpu_custom_call.1
= control target key start
LH: loop header
LB: loop body
LE: loop exit
PB: predicated region body
PF: predicated region fallthrough
CT: control target
= control target key end

     0   :  { %10 = vsyncpa [#allocation3], 0  ;;  %s1231_s0 = inlined_call_operand.hbm [shape: f32[2,32,256], index: 0, kind: input, shape index: {}]   ;;  %s1232_s1 = inlined_call_operand.vmem [shape: f32[4,32], index: 1, kind: input, shape index: {}]   ;;  %s1233_s2 = inlined_call_operand.vmem [shape: f32[4,1], index: 2, kind: input, shape index: {}]   ;;  %s1234_s3 = inlined_call_operand.vmem [shape: f32[32,4], index: 3, kind: input, shape index: {}]   ;;  %s1235_s4 = inlined_call_operand.vmem [shape: f32[32,1], index: 4, kind: input, shape index: {}]   ;;  %s1236_s5 = inlined_call_operand.hbm [shape: f32[2,32,256], index: 5, kind: output, shape index: {}]  }
   0x1   :  { %12 = vsyncpa [#allocation3 + $0x1], 0 }
   0x2   :  { %13 = vsyncpa [#allocation4], 0 }
   0x3   :  { %15 = vsyncpa [#allocation4 + $0x1], 0  ;;  %s995_s18 = smov 0   ;;  %s997_s19 = smov 0  }
   0x4   :  { %s999_s20 = smov 0   ;;  %s1001_s21 = smov 0  }
   0x5   :  { %s1003_s22 = smov 0   ;;  %s1005_s23 = smov 0  }
   0x6 LB: > { %s705_s24 = sadd.s32 4294967295, %s958_s23   ;;  %s706_s25 = sadd.s32 4294967294, %s958_s23   ;;  %s958_s23 = sphi %s1005_s23, %s21_s23   ;;  %s954_s22 = sphi %s1003_s22, %s1249_s22   ;;  %s950_s21 = sphi %s1001_s21, %s1248_s21   ;;  %s946_s20 = sphi %s999_s20, %s1247_s20   ;;  %s942_s19 = sphi %s997_s19, %s1246_s19   ;;  %s938_s18 = sphi %s995_s18, %s1245_s18  }
   0x7   : > { %s33_s26 = sadd.s32 1, %s954_s22  ;;  %s42_s27 = sadd.s32 1, %s946_s20 }
   0x8   : > { %p35_p0 = scmp.ge.s32.totalorder %s33_s26, 2  ;;  %p49_p1 = scmp.ne.s32.totalorder %s946_s20, %s942_s19 }
   0x9   : > { %p50_p2 = scmp.eq.s32.totalorder %s958_s23, 0  ;;  %p55_p3 = scmp.ne.s32.totalorder %s942_s19, %s938_s18 }
   0xa   : > { %s1251_s26 = smov (%p35_p0, %s33_s26), 0  ;;  %p56_p5 = scmp.eq.s32.totalorder %s705_s24, 0 }
   0xb   : > { %p1036_p4 = por %p50_p2, %p49_p1  ;;  %s37_s29 = ssub.s32 %s954_s22, %s1251_s26 }
   0xc   : > { %p165_p6 = scmp.eq.s32.totalorder %s705_s24, 1  ;;  %p40_p7 = scmp.eq.s32.totalorder %s37_s29, 0 }
   0xd   : > { %p1042_p8 = por %p56_p5, %p55_p3  ;;  %p171_p10 = scmp.eq.s32.totalorder %s706_s25, 1 }
   0xe   : > { %p1046_p9 = por %p165_p6, %p49_p1  ;;  %p708_p12 = scmp.ge.s32.totalorder %s958_s23, 2 }
   0xf   : > { %s1051_s7 = scalar_select %p40_p7, %s946_s20, %s42_s27  }
  0x10   : > { %p1053_p11 = por %p171_p10, %p55_p3  ;;  %p756_p13 = scmp.lt.s32.totalorder %s958_s23, 2 }
  0x11   : > { %s203_s9 = sand.u32 1, %s946_s20   ;;  %s740_s11 = sshll.u32 %s954_s22, 6 }
  0x12   : > { %s709_s10 = sshll.u32 %s203_s9, 6  ;;  %s214_s14 = scalar_lea.hbm %s1231_s0, %s740_s11 }
  0x13   : > { %s207_s15 = scalar_lea.vmem [#allocation2], %s709_s10  ;;  %s215_s17 = sshll.u32 %s214_s14, 4  ;;  %s216_s17 = int_to_ptr.hbm [resolvable:$true] %s215_s17 }
  0x14   : > { %s217_s16 = sshll.u32 %s207_s15, 4  ;;  %p749_p0 = pnand %p756_p13, %p1036_p4  ;;  %s218_s16 = int_to_ptr.vmem [resolvable:$true] %s217_s16 }
  0x15   : > { %p712_p1 = scmp.ge.s32.totalorder %s958_s23, 1  ;;  %s204_s24 = scalar_lea.sflag [#allocation3], %s203_s9 }
  0x16   : > { %s960_s25 = smov 256   ;;  %s961_s27 = smov 16  }
  0x17   : > { %751 = dma.hbm_to_vmem [thread:$0]  (!%p749_p0), %s216_s17, 1024, %s218_s16, %s204_s24, %s960_s25, %s960_s25, %s961_s27  }
  0x18   : > { %p225_p2 = scmp.lt.s32.totalorder %s958_s23, 3 }
  0x1a   : > { %p226_p3 = pnand %p712_p1, %p225_p2 }
  0x1b   : > { %s1069_s29 = sand.u32 (!%p226_p3), 1, %s942_s19  }
  0x1c   : > { %229 = sbr.rel (%p226_p3) target bundleno = 360 (0x168), region = 40  ;;  %s713_s10 = sshll.u32 (!%p226_p3), %s1069_s29, 6 }
  0x1d   : > { %s232_s11 = scalar_lea.sflag (!%p226_p3), [#allocation3], %s1069_s29  ;;  %s235_s28 = scalar_lea.vmem (!%p226_p3), [#allocation2], %s713_s10 }
  0x21   : > { %929 = dma.done.wait (%p1042_p8), %s232_s11, 1024  }
  0x22   : > { %931 = vsyncadd (%p1042_p8), %s232_s11, 4294966272  ;;  %v962_v0 = vmov 0   ;;  %v1079_v1 = vld [vmem:[%s235_s28 + $0x30] sm:$0xff]  ;;  %v1081_v2 = vld [vmem:[%s235_s28 + $0x38] sm:$0xff]  ;;  %vm280_vm0 = vcmask 261120   ;;  %vm367_vm1 = vcmask 1043456  }
  0x23   : > { %811 = vset.pattern.permute.xlu0 %v962_v0  ;;  %812 = vset.pattern.permute.xlu1 %v962_v0  ;;  %v1083_v3 = vld [vmem:[%s235_s28 + $0x20] sm:$0xff]  ;;  %v1087_v4 = vld [vmem:[%s235_s28 + $0x28] sm:$0xff]  ;;  %v1089_v5 = vld [vmem:[%s235_s28 + $0x10] sm:$0xff]  ;;  %vm354_vm2 = vcmask 31744   ;;  %s1164_s17 = scalar_lea.vmem [#allocation5], %s713_s10  ;;  %s741_s10 = sshll.u32 %s950_s21, 6 }
  0x24   : > { %813 = vset.pattern.permute.xlu2 %v962_v0  ;;  %296 = vmatpush.msra.mxu0 %v1079_v1  ;;  %v1091_v6 = vld [vmem:[%s235_s28 + $0x18] sm:$0xff]  ;;  %v274_v7 = vld [vmem:[%s1233_s2] sm:$0xf]  ;;  %v1100_v9 = vld [vmem:[%s235_s28 + $0x8] sm:$0xff]  ;;  %s614_s21 = scalar_lea.hbm %s1236_s5, %s741_s10  ;;  %s615_s27 = sshll.u32 %s1164_s17, 4  ;;  %s616_s27 = int_to_ptr.vmem [resolvable:$true] %s615_s27 }
  0x25   : > { %316 = vmatpush.msra.mxu1 %v1081_v2  ;;  %v1098_v8 = vld [vmem:[%s235_s28] sm:$0xff]  ;;  %277 = vperm.xlu0 %811, %v274_v7   ;;  %v331_v12 = vld [vmem:[%s1235_s4 + $0x8] sm:$0xff]  ;;  %v333_v13 = vld [vmem:[%s1235_s4 + $0x18] sm:$0xff]  ;;  %s617_s11 = sshll.u32 %s614_s21, 4  ;;  %s601_s28 = scalar_lea.sflag [#allocation4], %s1069_s29  ;;  %s618_s11 = int_to_ptr.hbm [resolvable:$true] %s617_s11 }
  0x26   : > { %297 = vmatpush.msra.mxu0 %v1083_v3  ;;  %v273_v10 = vld [vmem:[%s1232_s1] sm:$0xf]  ;;  %341 = vperm.xlu1 %812, %v331_v12   ;;  %v332_v14 = vld [vmem:[%s1235_s4 + $0x10] sm:$0xff]  ;;  %v327_v23 = vld [vmem:[%s1234_s3 + $0x8] sm:$0xff]  ;;  %s890_s30 = sshra.s32 %s618_s11, 4  ;;  %s896_s14 = scalar_lea.hbm %s1236_s5, 128  ;;  %s891_s30 = int_to_ptr.hbm [resolvable:$true] %s890_s30 }
  0x27   : > { %317 = vmatpush.msra.mxu1 %v1087_v4  ;;  %v330_v11 = vld [vmem:[%s1235_s4] sm:$0xff]  ;;  %351 = vperm.xlu2 %813, %v333_v13   ;;  %v328_v24 = vld [vmem:[%s1234_s3 + $0x10] sm:$0xff]  ;;  %v329_v25 = vld [vmem:[%s1234_s3 + $0x18] sm:$0xff]  ;;  %s892_s9 = scalar_lea.hbm %s891_s30, 64  ;;  %p897_p7 = scmp.lt.s32.totalorder %s891_s30, %s1236_s5 }
  0x28   : > { %298 = vmatpush.msra.mxu0 %v1089_v5  ;;  %v326_v22 = vld [vmem:[%s1234_s3] sm:$0xff]  ;;  %p893_p4 = scmp.ne.s32.totalorder %s891_s30, %s892_s9  ;;  %p898_p8 = scmp.lt.s32.totalorder %s896_s14, %s892_s9 }
  0x29   : > { %318 = vmatpush.msra.mxu1 %v1091_v6 }
  0x2a   : > { %299 = vmatpush.msra.mxu0 %v1098_v8  ;;  %p894_p5 = pnand %p893_p4, %p1046_p9  ;;  %p899_p10 = por %p898_p8, %p897_p7 }
  0x2b   : > { %319 = vmatpush.msra.mxu1 %v1100_v9  ;;  %715 = vmatmul.msk.f32.vlgmr.msra.gmra.mxu0 %vm280_vm0, %v273_v10 }
  0x2c   : > { %716 = vmatmul.msk.f32.vlgmr.msra.gmra.mxu1 %vm280_vm0, %v273_v10  ;;  %p895_p6 = pneg %p894_p5 }
  0x2d   : > { %336 = vperm.xlu0 %811, %v330_v11  }
  0x2e   : > { %346 = vperm.xlu1 %812, %v332_v14   ;;  %p900_p13 = pnand %p899_p10, %p895_p6 }
  0x81   : > { %v352_v62 = vpop.permute.xlu2 %351 }
  0x97   : > { %v278_v15 = vpop.permute.xlu0 %277 }
  0x98   : > { %v342_v32 = vpop.permute.xlu1 %341 }
  0x9f   : > { %v337_v26 = vpop.permute.xlu0 %336 }
  0xa0   : > { %v347_v44 = vpop.permute.xlu1 %346 }
  0xa8   : > { %v301_v16 = vpop.f32.mrf.mxu0 }
  0xa9   : > { %v321_v17 = vpop.f32.mrf.mxu1  ;;  %v302_v18 = vadd.f32 %v301_v16, %v278_v15 }
  0xaa   : > { %v322_v19 = vadd.f32 %v321_v17, %v278_v15 }
  0xab   : > { %v324_v20 = vmax.f32 %v302_v18, 0.0 }
  0xac   : > { %v325_v21 = vmax.f32 %v322_v19, 0.0 }
  0xad   : > { %717 = vmatpush.msk.msrb.mxu0 %vm367_vm1, %v324_v20  ;;  %742 = vmatpush.msk.msra.mxu2 %vm367_vm1, %v324_v20 }
  0xae   : > { %722 = vmatpush.msk.msrb.mxu1 %vm367_vm1, %v325_v21  ;;  %743 = vmatpush.msk.msra.mxu3 %vm367_vm1, %v325_v21 }
  0xaf   : > { %718 = vmatmul.msk.f32.vlgmr.msrb.gmra.mxu0 %vm354_vm2, %v326_v22  ;;  %719 = vmatmul.msk.f32.vlgmr.msra.gmra.mxu2 %vm354_vm2, %v327_v23 }
  0xb0   : > { %723 = vmatmul.msk.f32.vlgmr.msrb.gmra.mxu1 %vm354_vm2, %v326_v22  ;;  %724 = vmatmul.msk.f32.vlgmr.msra.gmra.mxu3 %vm354_vm2, %v327_v23 }
  0xb7   : > { %720 = vmatmul.msk.f32.gmra.mxu2 %vm354_vm2, %v328_v24 }
  0xb8   : > { %725 = vmatmul.msk.f32.gmra.mxu3 %vm354_vm2, %v328_v24 }
  0xbf   : > { %721 = vmatmul.msk.f32.gmra.mxu2 %vm354_vm2, %v329_v25 }
  0xc0   : > { %726 = vmatmul.msk.f32.gmra.mxu3 %vm354_vm2, %v329_v25 }
 0x12c   : > { %v391_v27 = vpop.f32.mrf.mxu0 }
 0x12d   : > { %v392_v28 = vadd.f32 %v391_v27, %v337_v26  ;;  %v420_v29 = vpop.f32.mrf.mxu1 }
 0x12e   : > { %v421_v30 = vadd.f32 %v420_v29, %v337_v26 }
 0x12f   : > { %v727_v31 = vmul.f32 -1.442695, %v392_v28 }
 0x130   : > { %v728_v33 = vmul.f32 -1.442695, %v421_v30 }
 0x131   : > { %814 = vpow2.f32 %v727_v31 }
 0x132   : > { %816 = vpow2.f32 %v728_v33  ;;  %v394_v34 = vpop.f32.mrf.mxu2 }
 0x133   : > { %v395_v35 = vadd.f32 %v394_v34, %v342_v32  ;;  %v423_v36 = vpop.f32.mrf.mxu3 }
 0x134   : > { %v424_v37 = vadd.f32 %v423_v36, %v342_v32 }
 0x135   : > { %v729_v38 = vmul.f32 -1.442695, %v395_v35 }
 0x136   : > { %v730_v39 = vmul.f32 -1.442695, %v424_v37 }
 0x137   : > { %v815_v40 = vpop.eup %814  ;;  %818 = vpow2.f32 %v729_v38 }
 0x138   : > { %v817_v41 = vpop.eup %816  ;;  %v456_v42 = vadd.f32 1.0, %v815_v40  ;;  %820 = vpow2.f32 %v730_v39 }
 0x139   : > { %v457_v43 = vadd.f32 1.0, %v817_v41 }
 0x13a   : > { %822 = vrcp.f32 %v456_v42  ;;  %v397_v45 = vpop.f32.mrf.mxu2  ;;  %v473_v51 = vand.u32 2147483647, %v456_v42  ;;  %v475_v53 = vand.u32 2147483648, %v456_v42  ;;  %vm469_vm3 = vweird.f32 %v456_v42 }
 0x13b   : > { %824 = vrcp.f32 %v457_v43  ;;  %v426_v46 = vpop.f32.mrf.mxu3  ;;  %v398_v47 = vadd.f32 %v397_v45, %v347_v44  ;;  %v488_v54 = vand.u32 2147483647, %v457_v43  ;;  %v490_v61 = vand.u32 2147483648, %v457_v43 }
 0x13c   : > { %v427_v48 = vadd.f32 %v426_v46, %v347_v44  ;;  %vm1139_vm4 = vcmp.eq.f32.partialorder %v473_v51, 8.507059e+37  ;;  %vm484_vm5 = vweird.f32 %v457_v43  ;;  %v476_v11 = vor.u32 1.1754944e-38, %v475_v53 }
 0x13d   : > { %v819_v49 = vpop.eup %818  ;;  %v731_v56 = vmul.f32 -1.442695, %v398_v47  ;;  %vm1143_vm6 = vcmp.eq.f32.partialorder %v488_v54, 8.507059e+37  ;;  %v491_v18 = vor.u32 1.1754944e-38, %v490_v61 }
 0x13e   : > { %v821_v50 = vpop.eup %820  ;;  %v1133_v52 = vadd.f32 1.0, %v819_v49  ;;  %v732_v58 = vmul.f32 -1.442695, %v427_v48 }
 0x13f   : > { %v1135_v55 = vadd.f32 1.0, %v821_v50 }
 0x140   : > { %v823_v57 = vpop.eup %822  ;;  %826 = vrcp.f32 %v1133_v52  ;;  %v503_v19 = vand.u32 2147483647, %v1133_v52  ;;  %v505_v27 = vand.u32 2147483648, %v1133_v52  ;;  %vm499_vm13 = vweird.f32 %v1133_v52 }
 0x141   : > { %v825_v59 = vpop.eup %824  ;;  %v465_v60 = vmul.f32 %v823_v57, %v456_v42  ;;  %828 = vrcp.f32 %v1135_v55  ;;  %vm470_vm7 = vweird.f32 %v823_v57  ;;  %v518_v28 = vand.u32 2147483647, %v1135_v55 }
 0x142   : > { %v480_v0 = vmul.f32 %v825_v59, %v457_v43  ;;  %v400_v7 = vpop.f32.mrf.mxu2  ;;  %830 = vpow2.f32 %v731_v56  ;;  %vm485_vm8 = vweird.f32 %v825_v59  ;;  %vm471_vm9 = vmor %vm469_vm3, %vm470_vm7  ;;  %v520_v31 = vand.u32 2147483648, %v1135_v55 }
 0x143   : > { %v466_v10 = vsub.f32 1.0, %v465_v60  ;;  %v429_v13 = vpop.f32.mrf.mxu3  ;;  %832 = vpow2.f32 %v732_v58  ;;  %v401_v15 = vadd.f32 %v400_v7, %v352_v62  ;;  %vm486_vm10 = vmor %vm484_vm5, %vm485_vm8  ;;  %v506_v47 = vor.u32 1.1754944e-38, %v505_v27 }
 0x144   : > { %v481_v14 = vsub.f32 1.0, %v480_v0  ;;  %v430_v16 = vadd.f32 %v429_v13, %v352_v62  ;;  %vm514_vm15 = vweird.f32 %v1135_v55  ;;  %vm504_vm0 = vcmp.eq.f32.partialorder %v503_v19, 8.507059e+37 }
 0x145   : > { %v467_v17 = vmul.f32 %v823_v57, %v466_v10  ;;  %v733_v22 = vmul.f32 -1.442695, %v401_v15  ;;  %v521_v50 = vor.u32 1.1754944e-38, %v520_v31  ;;  %vm519_vm2 = vcmp.eq.f32.partialorder %v518_v28, 8.507059e+37 }
 0x146   : > { %v827_v20 = vpop.eup %826  ;;  %v482_v21 = vmul.f32 %v825_v59, %v481_v14  ;;  %v734_v23 = vmul.f32 -1.442695, %v430_v16 }
 0x147   : > { %v829_v24 = vpop.eup %828  ;;  %v468_v25 = vadd.f32 %v823_v57, %v467_v17  ;;  %v495_v26 = vmul.f32 %v827_v20, %v1133_v52  ;;  %834 = vpow2.f32 %v733_v22  ;;  %vm500_vm11 = vweird.f32 %v827_v20 }
 0x148   : > { %v483_v29 = vadd.f32 %v825_v59, %v482_v21  ;;  %v510_v30 = vmul.f32 %v829_v24, %v1135_v55  ;;  %v831_v32 = vpop.eup %830  ;;  %836 = vpow2.f32 %v734_v23  ;;  %vm515_vm12 = vweird.f32 %v829_v24  ;;  %vm501_vm14 = vmor %vm499_vm13, %vm500_vm11 }
 0x149   : > { %v472_v33 = vsel %vm471_vm9, %v823_v57, %v468_v25  ;;  %v496_v34 = vsub.f32 1.0, %v495_v26  ;;  %v833_v35 = vpop.eup %832  ;;  %v460_v39 = vadd.f32 1.0, %v831_v32  ;;  %vm516_vm1 = vmor %vm514_vm15, %vm515_vm12 }
 0x14a   : > { %v477_v36 = vsel %vm1139_vm4, %v476_v11, %v472_v33  ;;  %v487_v37 = vsel %vm486_vm10, %v825_v59, %v483_v29  ;;  %v511_v38 = vsub.f32 1.0, %v510_v30  ;;  %v461_v44 = vadd.f32 1.0, %v833_v35 }
 0x14b   : > { %v584_v40 = vmul.f32 %v477_v36, %v1098_v8  ;;  %v492_v41 = vsel %vm1143_vm6, %v491_v18, %v487_v37  ;;  %v497_v42 = vmul.f32 %v827_v20, %v496_v34  ;;  %838 = vrcp.f32 %v460_v39 }
 0x14c   : > { %v585_v43 = vmul.f32 %v492_v41, %v1100_v9  ;;  %v512_v45 = vmul.f32 %v829_v24, %v511_v38  ;;  %840 = vrcp.f32 %v461_v44  ;;  %v533_v63 = vand.u32 2147483647, %v460_v39 }
 0x14d   : > { %592 = vst [vmem:[%s1164_s17] sm:$0xff] %v584_v40  ;;  %v498_v46 = vadd.f32 %v827_v20, %v497_v42  ;;  %v835_v8 = vpop.eup %834  ;;  %v535_v0 = vand.u32 2147483648, %v460_v39  ;;  %v548_v10 = vand.u32 2147483647, %v461_v44  ;;  %vm529_vm4 = vweird.f32 %v460_v39 }
 0x14e   : > { %593 = vst [vmem:[%s1164_s17 + $0x8] sm:$0xff] %v585_v43  ;;  %v513_v48 = vadd.f32 %v829_v24, %v512_v45  ;;  %v837_v9 = vpop.eup %836  ;;  %v462_v51 = vadd.f32 1.0, %v835_v8  ;;  %vm534_vm6 = vcmp.eq.f32.partialorder %v533_v63, 8.507059e+37  ;;  %vm544_vm7 = vweird.f32 %v461_v44 }
 0x14f   : > { %v502_v49 = vsel %vm501_vm14, %v827_v20, %v498_v46  ;;  %v1174_v55 = vadd.f32 1.0, %v837_v9  ;;  %v536_v15 = vor.u32 1.1754944e-38, %v535_v0  ;;  %vm549_vm9 = vcmp.eq.f32.partialorder %v548_v10, 8.507059e+37 }
 0x150   : > { %v507_v53 = vsel %vm504_vm0, %v506_v47, %v502_v49  ;;  %v517_v52 = vsel %vm516_vm1, %v829_v24, %v513_v48  ;;  %842 = vrcp.f32 %v462_v51  ;;  %v563_v21 = vand.u32 2147483647, %v462_v51 }
 0x151   : > { %v586_v54 = vmul.f32 %v507_v53, %v1089_v5  ;;  %v522_v56 = vsel %vm519_vm2, %v521_v50, %v517_v52  ;;  %v839_v57 = vpop.eup %838  ;;  %844 = vrcp.f32 %v1174_v55  ;;  %v550_v5 = vand.u32 2147483648, %v461_v44 }
 0x152   : > { %v587_v58 = vmul.f32 %v522_v56, %v1091_v6  ;;  %v841_v59 = vpop.eup %840  ;;  %v525_v60 = vmul.f32 %v839_v57, %v460_v39  ;;  %vm530_vm3 = vweird.f32 %v839_v57  ;;  %v565_v22 = vand.u32 2147483648, %v462_v51 }
 0x153   : > { %594 = vst [vmem:[%s1164_s17 + $0x10] sm:$0xff] %v586_v54  ;;  %v540_v61 = vmul.f32 %v841_v59, %v461_v44  ;;  %vm545_vm5 = vweird.f32 %v841_v59  ;;  %vm531_vm8 = vmor %vm529_vm4, %vm530_vm3  ;;  %v551_v17 = vor.u32 1.1754944e-38, %v550_v5  ;;  %vm559_vm12 = vweird.f32 %v462_v51 }
 0x154   : > { %595 = vst [vmem:[%s1164_s17 + $0x18] sm:$0xff] %v587_v58  ;;  %v526_v62 = vsub.f32 1.0, %v525_v60  ;;  %vm546_vm10 = vmor %vm544_vm7, %vm545_vm5  ;;  %vm564_vm14 = vcmp.eq.f32.partialorder %v563_v21, 8.507059e+37  ;;  %v566_v32 = vor.u32 1.1754944e-38, %v565_v22  ;;  %v580_v33 = vand.u32 2147483648, %v1174_v55 }
 0x155   : > { %v541_v7 = vsub.f32 1.0, %v540_v61  ;;  %vm574_vm0 = vweird.f32 %v1174_v55 }
 0x156   : > { %v843_v11 = vpop.eup %842  ;;  %v527_v12 = vmul.f32 %v839_v57, %v526_v62  ;;  %v581_v38 = vor.u32 1.1754944e-38, %v580_v33 }
 0x157   : > { %v542_v6 = vmul.f32 %v841_v59, %v541_v7  ;;  %v555_v13 = vmul.f32 %v843_v11, %v462_v51  ;;  %v845_v19 = vpop.eup %844  ;;  %vm560_vm11 = vweird.f32 %v843_v11 }
 0x158   : > { %v528_v14 = vadd.f32 %v839_v57, %v527_v12  ;;  %v570_v26 = vmul.f32 %v845_v19, %v1174_v55  ;;  %vm561_vm13 = vmor %vm559_vm12, %vm560_vm11  ;;  %vm575_vm15 = vweird.f32 %v845_v19 }
 0x159   : > { %v543_v16 = vadd.f32 %v841_v59, %v542_v6  ;;  %v556_v18 = vsub.f32 1.0, %v555_v13  ;;  %vm576_vm1 = vmor %vm574_vm0, %vm575_vm15 }
 0x15a   : > { %v532_v20 = vsel %vm531_vm8, %v839_v57, %v528_v14  ;;  %v571_v31 = vsub.f32 1.0, %v570_v26 }
 0x15b   : > { %v537_v23 = vsel %vm534_vm6, %v536_v15, %v532_v20  ;;  %v547_v24 = vsel %vm546_vm10, %v841_v59, %v543_v16  ;;  %v557_v25 = vmul.f32 %v843_v11, %v556_v18 }
 0x15c   : > { %v588_v27 = vmul.f32 %v537_v23, %v1083_v3  ;;  %v552_v28 = vsel %vm549_vm9, %v551_v17, %v547_v24  ;;  %v572_v34 = vmul.f32 %v845_v19, %v571_v31 }
 0x15d   : > { %v589_v29 = vmul.f32 %v552_v28, %v1087_v4  ;;  %v558_v30 = vadd.f32 %v843_v11, %v557_v25  ;;  %v578_v4 = vand.u32 2147483647, %v1174_v55 }
 0x15e   : > { %596 = vst [vmem:[%s1164_s17 + $0x20] sm:$0xff] %v588_v27  ;;  %v573_v37 = vadd.f32 %v845_v19, %v572_v34 }
 0x15f   : > { %597 = vst [vmem:[%s1164_s17 + $0x28] sm:$0xff] %v589_v29  ;;  %v562_v3 = vsel %vm561_vm13, %v843_v11, %v558_v30  ;;  %vm579_vm2 = vcmp.eq.f32.partialorder %v578_v4, 8.507059e+37 }
 0x160   : > { %v567_v35 = vsel %vm564_vm14, %v566_v32, %v562_v3  ;;  %v577_v39 = vsel %vm576_vm1, %v845_v19, %v573_v37 }
 0x161   : > { %v590_v36 = vmul.f32 %v567_v35, %v1079_v1  ;;  %v582_v40 = vsel %vm579_vm2, %v581_v38, %v577_v39 }
 0x162   : > { %v591_v41 = vmul.f32 %v582_v40, %v1081_v2 }
 0x163   : > { %598 = vst [vmem:[%s1164_s17 + $0x30] sm:$0xff] %v590_v36 }
 0x164   : > { %599 = vst [vmem:[%s1164_s17 + $0x38] sm:$0xff] %v591_v41 }
 0x165   : > { %903 = shalt.err (!%p900_p13)
}
 0x166   : > { %s963_s29 = smov 256   ;;  %s964_s17 = smov 16  }
 0x167   : > { %746 = dma.vmem_to_hbm [thread:$0]  (%p1046_p9), %s616_s27, 1024, %s618_s11, %s601_s28, %s963_s29, %s963_s29, %s964_s17  }
 0x168 PF: > { %s632_s10 = sand.u32 1, %s938_s18   ;;  %p753_p0 = pnand %p708_p12, %p1053_p11 }
 0x169   : > { %s633_s24 = scalar_lea.sflag [#allocation4], %s632_s10 }
 0x16a   : > { %p754_p1 = pneg %p753_p0 }
 0x16c   : > { %933 = dma.done.wait (%p754_p1), %s633_s24, 1024  }
 0x16d   : > { %935 = vsyncadd (%p754_p1), %s633_s24, 4294966272  ;;  %s21_s23 = sadd.s32 1, %s958_s23   ;;  %s1245_s18 = smov %s942_s19 }
 0x16e   : > { %p18_p2 = scmp.ge.s32.totalorder %s21_s23, 4   ;;  %s1246_s19 = smov %s946_s20 }
 0x16f   : > { %s1247_s20 = smov %s1051_s7  ;;  %s1248_s21 = smov %s954_s22 }
 0x170   : > { %s1249_s22 = smov %s1251_s26  ;;  %20 = sbr.rel (!%p18_p2) target bundleno = 6 (0x6), region = 85 }
 0x175   :  { %639 = vsyncpa [#allocation3], 1 }
 0x176   :  { %641 = vsyncpa [#allocation3 + $0x1], 1 }
 0x177   :  { %642 = vsyncpa [#allocation4], 1 }
 0x178   :  { %644 = vsyncpa [#allocation4 + $0x1], 1 }

</bundles_post_ra>
